<compile_context>
chip_gen: v6e
topology: v6e:2x2x1
jax: 0.10.0
libtpu: 0.0.40
codegen_flags: <defaults>
</compile_context>

<pallas_src>
import functools
import math

import jax
import jax.numpy as jnp
from jax import lax
from jax.experimental import pallas as pl
from jax.experimental.pallas import tpu as pltpu


def _label_smoothing_partials_kernel(
        x_ref, tgt_ref, xsum_ref, tsum_ref, *,
        pad_idx, n_rows, n_cols, tile_n, tile_v, chunk,
        has_row_tail, has_col_tail):
    """Accumulate per-row-block partial sums for one (rows, vocab) tile.

    xsum_ref: (1, 8, tile_v) slab accumulating x over valid (non-pad) columns.
    tsum_ref: (1, 8, tile_v) slab accumulating x[r, tgt[r]] (only if tgt != pad).
    Both are resident across the vocab (j) reduction axis.
    """
    i = pl.program_id(0)          # row-block axis ("parallel")
    j = pl.program_id(1)          # vocab-block axis ("arbitrary" reduction)

    @pl.when(j == 0)
    def _init():
        xsum_ref[...] = jnp.zeros_like(xsum_ref)
        tsum_ref[...] = jnp.zeros_like(tsum_ref)

    # Column-only work: once per grid step on a (1, tile_v) slab -- O(tile_v),
    # not O(tile_n * tile_v).  The vocab-tail mask is folded in here at compile
    # time, so the per-element path never pays for it.
    col = j * tile_v + lax.broadcasted_iota(jnp.int32, (1, tile_v), 1)
    col_valid = col != pad_idx
    if has_col_tail:
        col_valid = jnp.logical_and(col_valid, col < n_cols)

    n_chunks = tile_n // chunk

    def accumulate(mask_rows):
        # Walk the block in `chunk`-row slices, accumulating straight into the
        # output refs so live VMEM temporaries stay at ~chunk*tile_v elements.
        def body(c, carry):
            r0 = pl.multiple_of(c * chunk, 8)
            x = x_ref[pl.ds(r0, chunk), :].astype(jnp.float32)   # (chunk, tile_v)
            tgt = tgt_ref[pl.ds(r0, chunk), :]                   # (chunk, 1)
            xv = jnp.where(col_valid, x, 0.0)                    # pad/tail cols -> 0
            if mask_rows:                                        # last row block only
                row = (i * tile_n + r0
                       + lax.broadcasted_iota(jnp.int32, (chunk, 1), 0))
                xv = jnp.where(row < n_rows, xv, 0.0)            # padded rows -> 0
            xt = jnp.where(col == tgt, xv, 0.0)                  # x at target column
            # Sublane fold (chunk, tile_v) -> (8, tile_v): pure VPU vreg adds.
            xsum_ref[0] += xv.reshape(chunk // 8, 8, tile_v).sum(axis=0)
            tsum_ref[0] += xt.reshape(chunk // 8, 8, tile_v).sum(axis=0)
            return carry
        lax.fori_loop(0, n_chunks, body, 0)

    if has_row_tail:
        ni = pl.num_programs(0)

        @pl.when(i != ni - 1)
        def _full_blocks():
            accumulate(mask_rows=False)

        @pl.when(i == ni - 1)
        def _tail_block():
            accumulate(mask_rows=True)
    else:
        accumulate(mask_rows=False)


def label_smoothing_loss(x, target, *, vocab_size, pad_idx, smoothing=0.1):
    """Forward pass of LabelSmoothing. x: [B, T, V] log-probs, target: [B, T] ints."""
    B, T, V = x.shape
    assert V == vocab_size, "last dim of x must equal vocab_size"

    confidence = 1.0 - smoothing
    smooth = smoothing / (vocab_size - 2)
    log_conf = math.log(confidence) if confidence > 0.0 else 0.0
    log_smooth = math.log(smooth) if smooth > 0.0 else 0.0

    N = B * T
    x2 = x.reshape(N, V)                          # native dtype, no host-side pad
    tgt2 = target.reshape(N, 1).astype(jnp.int32)

    # ---- Tile selection ----------------------------------------------------
    SUB = 8
    itemsize = jnp.dtype(x.dtype).itemsize
    tile_v = V if V <= 8192 else 2048             # lane tile (full vocab if it fits)
    budget = 8 * 1024 * 1024                      # <= ~8 MiB of x per block
    tile_n = max(SUB, min(1024, budget // (tile_v * itemsize)))
    n_rows_padded = ((N + SUB - 1) // SUB) * SUB
    tile_n = min(tile_n, n_rows_padded)
    if tile_n >= 128:
        tile_n = (tile_n // 128) * 128            # chunk-friendly
        chunk = 128
    else:
        tile_n = max(SUB, (tile_n // SUB) * SUB)
        chunk = tile_n

    NI = pl.cdiv(N, tile_n)
    NJ = pl.cdiv(V, tile_v)
    has_row_tail = (N % tile_n) != 0
    has_col_tail = (V % tile_v) != 0

    kernel = functools.partial(
        _label_smoothing_partials_kernel,
        pad_idx=pad_idx, n_rows=N, n_cols=V,
        tile_n=tile_n, tile_v=tile_v, chunk=chunk,
        has_row_tail=has_row_tail, has_col_tail=has_col_tail)

    out_slab = jax.ShapeDtypeStruct((NI, 8, tile_v), jnp.float32)
    xsum_slab, tsum_slab = pl.pallas_call(
        kernel,
        out_shape=(out_slab, out_slab),
        grid_spec=pltpu.PrefetchScalarGridSpec(
            num_scalar_prefetch=0,
            grid=(NI, NJ),
            in_specs=[
                pl.BlockSpec((tile_n, tile_v), lambda i, j: (i, j)),   # log-probs
                pl.BlockSpec((tile_n, 1), lambda i, j: (i, 0)),        # targets
            ],
            out_specs=[
                pl.BlockSpec((1, 8, tile_v), lambda i, j: (i, 0, 0)),  # sum(x) slab
                pl.BlockSpec((1, 8, tile_v), lambda i, j: (i, 0, 0)),  # x[r,tgt] slab
            ],
        ),
        compiler_params=pltpu.CompilerParams(
            # "parallel" on the row axis shards it across TensorCores on
            # multi-TC chips (v7x / megacore); it is a plain serial loop on
            # single-TC v5e/v6e with no extra overhead or duplicated blocks.
            dimension_semantics=("parallel", "arbitrary"),
            vmem_limit_bytes=48 * 1024 * 1024,    # fits v7x's 64 MiB with headroom
        ),
        cost_estimate=pl.CostEstimate(
            flops=5 * N * V,
            transcendentals=0,
            bytes_accessed=N * V * itemsize + N * 4 + 2 * NI * 8 * tile_v * 4),
    )(x2, tgt2)

    # ---- Tiny O(N) epilogue in plain XLA ------------------------------------
    S = jnp.sum(xsum_slab)                            # sum x over valid (r, v!=pad)
    Tsum = jnp.sum(tsum_slab)                         # sum x[r, tgt[r]] for tgt!=pad
    n_real = jnp.sum((target != pad_idx).astype(jnp.float32))

    c1 = confidence * log_conf - smooth * log_smooth  # per-target constant delta
    c2 = confidence - smooth                          # per-target x-coefficient delta
    bulk_const = float(N) * float(V - 1) * smooth * log_smooth
    return (bulk_const - smooth * S) + c1 * n_real - c2 * Tsum


def _reference_loss(x, target, *, vocab_size, pad_idx, smoothing=0.1):
    """Pure-JAX reference matching the PyTorch module, for validation."""
    B, T, V = x.shape
    confidence = 1.0 - smoothing
    smooth = smoothing / (vocab_size - 2)
    col = jnp.arange(V, dtype=jnp.int32)[None, None, :]
    td = jnp.where(col == target[..., None], confidence, smooth)
    td = jnp.where(col == pad_idx, 0.0, td)
    safe = jnp.where(td > 0, td, 1.0)
    return jnp.sum(jnp.where(td > 0, td * (jnp.log(safe) - x), 0.0))


if __name__ == "__main__":
    key = jax.random.PRNGKey(0)
    B, T, V = 2, 8, 32          # batch, trg_seq_len - 1, vocab_size
    pad_idx = 0
    smoothing = 0.1

    k1, k2 = jax.random.split(key)
    logits = jax.random.normal(k1, (B, T, V), dtype=jnp.float32)
    x = jax.nn.log_softmax(logits, axis=-1)          # KLDivLoss expects log-probs
    target = jax.random.randint(k2, (B, T), 0, V, dtype=jnp.int32)

    loss = label_smoothing_loss(x, target, vocab_size=V, pad_idx=pad_idx,
                                smoothing=smoothing)
    loss = jax.block_until_ready(loss)

    ref = _reference_loss(x, target, vocab_size=V, pad_idx=pad_idx,
                          smoothing=smoothing)
    assert jnp.allclose(loss, ref, rtol=1e-4, atol=1e-4), (loss, ref)

    # TODO(synk): backward pass (KLDivLoss grad w.r.t. x) not implemented; forward only.
    print("KERNEL_OK")
</pallas_src>

<mosaic_0001>
module attributes {stable_mosaic.version = 11 : i64} {
  func.func @_label_smoothing_partials_kernel(%arg0: i32, %arg1: i32, %arg2: memref<16x32xf32, #tpu.memory_space<vmem>>, %arg3: memref<16x1xi32, #tpu.memory_space<vmem>>, %arg4: memref<1x8x32xf32, #tpu.memory_space<vmem>>, %arg5: memref<1x8x32xf32, #tpu.memory_space<vmem>>) attributes {dimension_semantics = [#tpu.dimension_semantics<parallel>, #tpu.dimension_semantics<arbitrary>], iteration_bounds = array<i64: 1, 1>, scalar_prefetch = 0 : i64, scratch_operands = 0 : i64, tpu.core_type = #tpu.core_type<tc>, window_params = [{transform_indices = @transform_0, window_bounds = array<i64: 16, 32>}, {transform_indices = @transform_1, window_bounds = array<i64: 16, 1>}, {transform_indices = @transform_2, window_bounds = array<i64: 1, 8, 32>}, {transform_indices = @transform_3, window_bounds = array<i64: 1, 8, 32>}]} {
    %c0_i32 = arith.constant 0 : i32
    %0 = arith.cmpi eq, %arg1, %c0_i32 : i32
    %1 = arith.extui %0 : i1 to i32
    %c0_i32_0 = arith.constant 0 : i32
    %2 = arith.cmpi ne, %1, %c0_i32_0 : i32
    scf.if %2 {
      %cst_19 = arith.constant 0.000000e+00 : f32
      %40 = vector.broadcast %cst_19 : f32 to vector<1x8x32xf32>
      %c0_20 = arith.constant 0 : index
      %c0_21 = arith.constant 0 : index
      %c0_22 = arith.constant 0 : index
      %41 = vector.load %arg4[%c0_20, %c0_21, %c0_22] : memref<1x8x32xf32, #tpu.memory_space<vmem>>, vector<1x8x32xf32>
      tpu.vector_store %arg4[%c0_20, %c0_21, %c0_22], %40 {strides = array<i32>} : memref<1x8x32xf32, #tpu.memory_space<vmem>>, vector<1x8x32xf32>,
      %cst_23 = arith.constant 0.000000e+00 : f32
      %42 = vector.broadcast %cst_23 : f32 to vector<1x8x32xf32>
      %c0_24 = arith.constant 0 : index
      %c0_25 = arith.constant 0 : index
      %c0_26 = arith.constant 0 : index
      %43 = vector.load %arg5[%c0_24, %c0_25, %c0_26] : memref<1x8x32xf32, #tpu.memory_space<vmem>>, vector<1x8x32xf32>
      tpu.vector_store %arg5[%c0_24, %c0_25, %c0_26], %42 {strides = array<i32>} : memref<1x8x32xf32, #tpu.memory_space<vmem>>, vector<1x8x32xf32>,
    } else {
    }
    %c32_i32 = arith.constant 32 : i32
    %3 = arith.muli %arg1, %c32_i32 : i32
    %4 = tpu.iota {dimensions = array<i32: 1>} : vector<1x32xi32>
    %5 = vector.broadcast %3 : i32 to vector<1x32xi32>
    %6 = arith.addi %5, %4 : vector<1x32xi32>
    %c0_i32_1 = arith.constant 0 : i32
    %7 = vector.broadcast %c0_i32_1 : i32 to vector<1x32xi32>
    %8 = arith.cmpi ne, %6, %7 : vector<1x32xi32>
    %c0_i32_2 = arith.constant 0 : i32
    %c16_i32 = arith.constant 16 : i32
    %9 = arith.muli %c0_i32_2, %c16_i32 : i32
    %10 = tpu.assume_multiple %9, 8 : i32
    %11 = arith.index_cast %10 : i32 to index
    %c0 = arith.constant 0 : index
    %12 = vector.load %arg2[%11, %c0] : memref<16x32xf32, #tpu.memory_space<vmem>>, vector<16x32xf32>
    %13 = arith.index_cast %10 : i32 to index
    %c0_3 = arith.constant 0 : index
    %14 = vector.load %arg3[%13, %c0_3] : memref<16x1xi32, #tpu.memory_space<vmem>>, vector<16x1xi32>
    %cst = arith.constant 0.000000e+00 : f32
    %15 = vector.shape_cast %8 : vector<1x32xi1> to vector<1x32xi1>
    %16 = vector.broadcast %15 : vector<1x32xi1> to vector<16x32xi1>
    %17 = vector.broadcast %cst : f32 to vector<16x32xf32>
    %18 = arith.select %16, %12, %17 : vector<16x32xi1>, vector<16x32xf32>
    %19 = vector.broadcast %6 : vector<1x32xi32> to vector<16x32xi32>
    %20 = vector.broadcast %14 : vector<16x1xi32> to vector<16x32xi32>
    %21 = arith.cmpi eq, %19, %20 : vector<16x32xi32>
    %cst_4 = arith.constant 0.000000e+00 : f32
    %22 = vector.broadcast %cst_4 : f32 to vector<16x32xf32>
    %23 = arith.select %21, %18, %22 : vector<16x32xi1>, vector<16x32xf32>
    %c0_5 = arith.constant 0 : index
    %c0_6 = arith.constant 0 : index
    %c0_7 = arith.constant 0 : index
    %24 = vector.load %arg4[%c0_5, %c0_6, %c0_7] : memref<1x8x32xf32, #tpu.memory_space<vmem>>, vector<1x8x32xf32>
    %25 = vector.shape_cast %24 : vector<1x8x32xf32> to vector<8x32xf32>
    %26 = vector.shape_cast %18 : vector<16x32xf32> to vector<2x8x32xf32>
    %cst_8 = arith.constant dense<0.000000e+00> : vector<8x32xf32>
    %27 = vector.multi_reduction <add>, %26, %cst_8 [0] : vector<2x8x32xf32> to vector<8x32xf32>
    %28 = arith.addf %25, %27 : vector<8x32xf32>
    %c0_9 = arith.constant 0 : index
    %c0_10 = arith.constant 0 : index
    %c0_11 = arith.constant 0 : index
    %29 = vector.load %arg4[%c0_9, %c0_10, %c0_11] : memref<1x8x32xf32, #tpu.memory_space<vmem>>, vector<1x8x32xf32>
    %30 = vector.shape_cast %29 : vector<1x8x32xf32> to vector<8x32xf32>
    %31 = vector.shape_cast %28 : vector<8x32xf32> to vector<1x8x32xf32>
    tpu.vector_store %arg4[%c0_9, %c0_10, %c0_11], %31 {strides = array<i32>} : memref<1x8x32xf32, #tpu.memory_space<vmem>>, vector<1x8x32xf32>,
    %c0_12 = arith.constant 0 : index
    %c0_13 = arith.constant 0 : index
    %c0_14 = arith.constant 0 : index
    %32 = vector.load %arg5[%c0_12, %c0_13, %c0_14] : memref<1x8x32xf32, #tpu.memory_space<vmem>>, vector<1x8x32xf32>
    %33 = vector.shape_cast %32 : vector<1x8x32xf32> to vector<8x32xf32>
    %34 = vector.shape_cast %23 : vector<16x32xf32> to vector<2x8x32xf32>
    %cst_15 = arith.constant dense<0.000000e+00> : vector<8x32xf32>
    %35 = vector.multi_reduction <add>, %34, %cst_15 [0] : vector<2x8x32xf32> to vector<8x32xf32>
    %36 = arith.addf %33, %35 : vector<8x32xf32>
    %c0_16 = arith.constant 0 : index
    %c0_17 = arith.constant 0 : index
    %c0_18 = arith.constant 0 : index
    %37 = vector.load %arg5[%c0_16, %c0_17, %c0_18] : memref<1x8x32xf32, #tpu.memory_space<vmem>>, vector<1x8x32xf32>
    %38 = vector.shape_cast %37 : vector<1x8x32xf32> to vector<8x32xf32>
    %39 = vector.shape_cast %36 : vector<8x32xf32> to vector<1x8x32xf32>
    tpu.vector_store %arg5[%c0_16, %c0_17, %c0_18], %39 {strides = array<i32>} : memref<1x8x32xf32, #tpu.memory_space<vmem>>, vector<1x8x32xf32>,
    %c1_i32 = arith.constant 1 : i32
    return
  }
  func.func @transform_0(%arg0: i32, %arg1: i32) -> (i32, i32) {
    %c0_i32 = arith.constant 0 : i32
    return %arg0, %arg1 : i32, i32
  }
  func.func @transform_1(%arg0: i32, %arg1: i32) -> (i32, i32) {
    %c0_i32 = arith.constant 0 : i32
    %c0_i32_0 = arith.constant 0 : i32
    return %arg0, %c0_i32 : i32, i32
  }
  func.func @transform_2(%arg0: i32, %arg1: i32) -> (i32, i32, i32) {
    %c0_i32 = arith.constant 0 : i32
    %c0_i32_0 = arith.constant 0 : i32
    %c0_i32_1 = arith.constant 0 : i32
    return %arg0, %c0_i32, %c0_i32_0 : i32, i32, i32
  }
  func.func @transform_3(%arg0: i32, %arg1: i32) -> (i32, i32, i32) {
    %c0_i32 = arith.constant 0 : i32
    %c0_i32_0 = arith.constant 0 : i32
    %c0_i32_1 = arith.constant 0 : i32
    return %arg0, %c0_i32, %c0_i32_0 : i32, i32, i32
  }
}

</mosaic_0001>

<bundles_post_ra>
// kernel: tpu_custom_call.1
= control target key start
LH: loop header
LB: loop body
LE: loop exit
PB: predicated region body
PF: predicated region fallthrough
CT: control target
= control target key end

     0   :  { %9 = vsyncpa [#allocation3], 0  ;;  %vm19_vm0 = vcmask 261120   ;;  %v23_v1 = vlaneseq  ;;  %v136_v2 = vmov 0   ;;  %v137_v3 = vmov 0.0   ;;  %s186_s0 = inlined_call_operand.vmem [shape: f32[16,32], index: 0, kind: input, shape index: {}]   ;;  %s187_s1 = inlined_call_operand.vmem [shape: s32[16,1], index: 1, kind: input, shape index: {}]   ;;  %s188_s2 = inlined_call_operand.hbm [shape: f32[1,8,32], index: 2, kind: output, shape index: {0}]   ;;  %s189_s3 = inlined_call_operand.hbm [shape: f32[1,8,32], index: 3, kind: output, shape index: {1}]  }
   0x1   :  { %v30_v0 = vld [vmem:[%s187_s1] sm:$0xff]  ;;  %91 = vset.pattern.permute.xlu0 %v136_v2  ;;  %21 = vst.msk [vmem:[#allocation4] sm:$0xff] %vm19_vm0, %v137_v3  ;;  %20 = vst.msk [vmem:[#allocation2] sm:$0xff] %vm19_vm0, %v137_v3 }
   0x2   :  { %10 = vsyncpa [#allocation5], 0  ;;  %37 = vperm.xlu0 %91, %v30_v0   ;;  %v24_v4 = vand.u32 127, %v23_v1  ;;  %v28_v5 = vld [vmem:[%s186_s0] sm:$0xff]  ;;  %v29_v6 = vld [vmem:[%s186_s0 + $0x8] sm:$0xff]  ;;  %s138_s20 = smov [#allocation2]  }
   0x3   :  { %v31_v7 = vld [vmem:[%s187_s1 + $0x8] sm:$0xff]  ;;  %s65_s21 = sshll.u32 %s138_s20, 4  ;;  %s66_s21 = int_to_ptr.vmem [resolvable:$true] %s65_s21 }
   0x4   :  { %vm27_vm1 = vcmp.ne.s32.totalorder %v24_v4, 0  ;;  %s92_s0 = scalar_lea.vmem %s66_s21, 128  ;;  %p97_p1 = scmp.lt.s32.totalorder %s66_s21, %s66_s21 }
   0x5   :  { %v34_v8 = vsel %vm27_vm1, %v28_v5, 0.0  ;;  %v35_v9 = vsel %vm27_vm1, %v29_v6, 0.0  ;;  %p93_p0 = scmp.ne.s32.totalorder %s66_s21, %s92_s0  ;;  %p98_p2 = scmp.lt.s32.totalorder %s92_s0, %s92_s0 }
   0x6   :  { %40 = vperm.xlu0 %91, %v31_v7   ;;  %v48_v10 = vsel %vm19_vm0, %v34_v8, 0.0  ;;  %v49_v11 = vsel %vm19_vm0, %v35_v9, 0.0 }
   0x7   :  { %v50_v12 = vadd.f32 %v49_v11, %v48_v10  ;;  %p99_p3 = por %p98_p2, %p97_p1 }
   0x8   :  { %v46_v13 = vld [vmem:[#allocation2] sm:$0xff] }
   0x9   :  { %v51_v14 = vadd.f32 %v50_v12, %v46_v13  ;;  %p100_p4 = pnand %p99_p3, %p93_p0 }
   0xb   :  { %52 = vst.msk [vmem:[#allocation2] sm:$0xff] %vm19_vm0, %v51_v14 }
   0xc   :  { %103 = shalt.err (!%p100_p4)
}
   0xd   :  { %68 = dma.vmem_to_hbm [thread:$0]  %s66_s21, 128, %s188_s2, [#allocation3]   ;;  %v53_v20 = vld [vmem:[#allocation4] sm:$0xff] }
   0xe   :  { %s139_s23 = smov [#allocation4]  }
   0xf   :  { %s75_s24 = sshll.u32 %s139_s23, 4  ;;  %s76_s24 = int_to_ptr.vmem [resolvable:$true] %s75_s24 }
  0x10   :  { %s112_s25 = scalar_lea.vmem %s76_s24, 128  ;;  %p117_p6 = scmp.lt.s32.totalorder %s76_s24, %s76_s24 }
  0x11   :  { %p113_p5 = scmp.ne.s32.totalorder %s76_s24, %s112_s25  ;;  %p118_p7 = scmp.lt.s32.totalorder %s112_s25, %s112_s25 }
  0x13   :  { %p119_p8 = por %p118_p7, %p117_p6 }
  0x15   :  { %p120_p9 = pnand %p119_p8, %p113_p5 }
  0x7d   :  { %v38_v15 = vpop.permute.xlu0 %37 }
  0x7e   :  { %vm42_vm2 = vcmp.eq.s32.totalorder %v24_v4, %v38_v15 }
  0x7f   :  { %v44_v16 = vsel %vm42_vm2, %v34_v8, 0.0 }
  0x80   :  { %v54_v19 = vsel %vm19_vm0, %v44_v16, 0.0 }
  0x81   :  { %v41_v17 = vpop.permute.xlu0 %40 }
  0x82   :  { %vm43_vm3 = vcmp.eq.s32.totalorder %v24_v4, %v41_v17 }
  0x83   :  { %v45_v18 = vsel %vm43_vm3, %v35_v9, 0.0 }
  0x84   :  { %v55_v21 = vsel %vm19_vm0, %v45_v18, 0.0 }
  0x85   :  { %v56_v22 = vadd.f32 %v55_v21, %v54_v19 }
  0x87   :  { %v57_v23 = vadd.f32 %v56_v22, %v53_v20 }
  0x89   :  { %58 = vst.msk [vmem:[#allocation4] sm:$0xff] %vm19_vm0, %v57_v23 }
  0x8a   :  { %123 = shalt.err (!%p120_p9)
}
  0x8b   :  { %78 = dma.vmem_to_hbm [thread:$0]  %s76_s24, 128, %s189_s3, [#allocation5]  }
  0x8c   :  { %132 = dma.done.wait [#allocation3], 128  }
  0x8d   :  { %133 = vsyncadd [#allocation3], 4294967168 }
  0x8e   :  { %134 = dma.done.wait [#allocation5], 128  }
  0x8f   :  { %135 = vsyncadd [#allocation5], 4294967168 }
  0x90   :  { %85 = vsyncpa [#allocation3], 1 }
  0x91   :  { %86 = vsyncpa [#allocation5], 1 }

</bundles_post_ra>
